<compile_context>
chip_gen: v7x
topology: tpu7x:2x2x1
jax: 0.10.0
libtpu: 0.0.40
codegen_flags: <defaults>
</compile_context>

<pallas_src>
import jax
import jax.numpy as jnp
from jax.experimental import pallas as pl
from jax.experimental.pallas import tpu as pltpu


def _make_rank_loss_kernel(enlarge: float, total: int, tile_rows: int,
                           lanes: int, sublanes: int, steps_per_core: int,
                           needs_mask: bool, first_masked_block: int):
    enlarge = float(enlarge)  # Python float -> inlined compile-time constant

    def kernel(left_ref, right_ref, out_ref, acc_ref):
        i = pl.program_id(1)

        @pl.when(i == 0)
        def _():
            acc_ref[...] = jnp.zeros_like(acc_ref)

        diff = (left_ref[...].astype(jnp.float32)
                - right_ref[...].astype(jnp.float32)) * enlarge
        # stable softplus(-diff) == log1p(exp(diff)) - diff  (exact both tails)
        loss = jnp.maximum(-diff, 0.0) + jnp.log1p(jnp.exp(-jnp.abs(diff)))

        def _accumulate(vals):
            # (tile_rows,128) -> (tile_rows//8, 8, 128) is (8,128)-tile aligned
            # (free); the axis-0 sum is plain vreg adds into a single-vreg acc.
            acc_ref[...] += jnp.sum(
                vals.reshape(tile_rows // sublanes, sublanes, lanes), axis=0)

        if needs_mask:
            gb = pl.program_id(0) * steps_per_core + i  # global block index

            @pl.when(gb < first_masked_block)
            def _():  # fully in-range block: no mask VPU work
                _accumulate(loss)

            @pl.when(gb >= first_masked_block)
            def _():  # tail / overhang block: mask out-of-range elements
                base = gb * (tile_rows * lanes)
                row = jax.lax.broadcasted_iota(jnp.int32, (tile_rows, lanes), 0)
                lane = jax.lax.broadcasted_iota(jnp.int32, (tile_rows, lanes), 1)
                elem = base + row * lanes + lane
                _accumulate(jnp.where(elem < total, loss, 0.0))
        else:
            _accumulate(loss)

        @pl.when(i == pl.num_programs(1) - 1)
        def _():
            out_ref[...] = acc_ref[...]  # lane-dense per-core partial sums

    return kernel


def rank_loss(left: jax.Array, right: jax.Array, enlarge: float = 5.0) -> jax.Array:
    assert left.shape == right.shape, "left/right must have the same shape"
    total = int(left.size)

    LANES = 128
    SUBLANES = 8
    MAX_TILE_ROWS = 4096   # 2 MiB per f32 input block
    NUM_CORES = 2          # v7x 2-TC split; plain outer loop on 1-TC chips

    chunk = SUBLANES * LANES  # 1024
    padded_total = -(-total // chunk) * chunk
    rows = padded_total // LANES  # multiple of 8

    def _prep(x):
        flat = x.reshape(-1)  # keep original dtype; cast to f32 in-kernel
        if padded_total != total:
            # Only hit when size % 1024 != 0; pad elements are masked in-kernel.
            flat = jnp.pad(flat, (0, padded_total - total))
        return flat.reshape(rows, LANES)

    left2d = _prep(left)
    right2d = _prep(right)

    tile_rows = min(MAX_TILE_ROWS, rows)          # multiple of 8
    n_blocks = -(-rows // tile_rows)
    steps_per_core = -(-n_blocks // NUM_CORES)
    block_elems = tile_rows * LANES
    needs_mask = (NUM_CORES * steps_per_core * block_elems) != total
    first_masked_block = total // block_elems
    last_block = n_blocks - 1

    if needs_mask:
        # Clamp overhang steps onto the last real block (their contribution is
        # fully masked to zero inside the kernel).
        def in_map(c, i):
            return (jnp.minimum(c * steps_per_core + i, last_block), 0)
    else:
        def in_map(c, i):
            return (c * steps_per_core + i, 0)

    kernel = _make_rank_loss_kernel(enlarge, total, tile_rows, LANES, SUBLANES,
                                    steps_per_core, needs_mask,
                                    first_masked_block)

    partials = pl.pallas_call(
        kernel,
        out_shape=jax.ShapeDtypeStruct((NUM_CORES * SUBLANES, LANES), jnp.float32),
        grid_spec=pltpu.PrefetchScalarGridSpec(
            num_scalar_prefetch=0,
            grid=(NUM_CORES, steps_per_core),
            in_specs=[
                pl.BlockSpec((tile_rows, LANES), in_map),
                pl.BlockSpec((tile_rows, LANES), in_map),
            ],
            out_specs=pl.BlockSpec((SUBLANES, LANES), lambda c, i: (c, 0)),
            scratch_shapes=[pltpu.VMEM((SUBLANES, LANES), jnp.float32)],
        ),
        compiler_params=pltpu.CompilerParams(
            dimension_semantics=("parallel", "arbitrary"),
        ),
    )(left2d, right2d)

    # Combine the per-core, per-lane partial sums (tiny XLA reduce) and take
    # the mean over the true (unpadded) element count.
    return jnp.sum(partials) / total


if __name__ == "__main__":
    key = jax.random.PRNGKey(0)
    k_left, k_right = jax.random.split(key)

    # small shapes consistent with a generic (B, C, H, W) input
    shape = (2, 4, 16, 16)
    left = jax.random.normal(k_left, shape, dtype=jnp.float32)
    right = jax.random.normal(k_right, shape, dtype=jnp.float32)

    enlarge = 5.0
    result = rank_loss(left, right, enlarge=enlarge)
    result = jax.block_until_ready(result)

    # pure-JAX reference check (exact PyTorch formula)
    diff = (left - right) * enlarge
    ref = jnp.mean(jnp.log1p(jnp.exp(diff)) - diff)
    assert jnp.allclose(result, ref, rtol=1e-5, atol=1e-5), (result, ref)

    print("KERNEL_OK")
</pallas_src>

<mosaic_0001>
module attributes {stable_mosaic.version = 11 : i64} {
  func.func @kernel(%arg0: i32, %arg1: i32, %arg2: memref<16x128xf32, #tpu.memory_space<vmem>>, %arg3: memref<16x128xf32, #tpu.memory_space<vmem>>, %arg4: memref<8x128xf32, #tpu.memory_space<vmem>>, %arg5: memref<8x128xf32, #tpu.memory_space<vmem>>) attributes {dimension_semantics = [#tpu.dimension_semantics<parallel>, #tpu.dimension_semantics<arbitrary>], iteration_bounds = array<i64: 2, 1>, scalar_prefetch = 0 : i64, scratch_operands = 1 : i64, tpu.core_type = #tpu.core_type<tc>, window_params = [{transform_indices = @transform_0, window_bounds = array<i64: 16, 128>}, {transform_indices = @transform_1, window_bounds = array<i64: 16, 128>}, {transform_indices = @transform_2, window_bounds = array<i64: 8, 128>}]} {
    %c0_i32 = arith.constant 0 : i32
    %0 = arith.cmpi eq, %arg1, %c0_i32 : i32
    %1 = arith.extui %0 : i1 to i32
    %c0_i32_0 = arith.constant 0 : i32
    %2 = arith.cmpi ne, %1, %c0_i32_0 : i32
    scf.if %2 {
      %cst_13 = arith.constant 0.000000e+00 : f32
      %29 = vector.broadcast %cst_13 : f32 to vector<8x128xf32>
      %c0_14 = arith.constant 0 : index
      %c0_15 = arith.constant 0 : index
      %30 = vector.load %arg5[%c0_14, %c0_15] : memref<8x128xf32, #tpu.memory_space<vmem>>, vector<8x128xf32>
      tpu.vector_store %arg5[%c0_14, %c0_15], %29 {strides = array<i32>} : memref<8x128xf32, #tpu.memory_space<vmem>>, vector<8x128xf32>,
    } else {
    }
    %c0 = arith.constant 0 : index
    %c0_1 = arith.constant 0 : index
    %3 = vector.load %arg2[%c0, %c0_1] : memref<16x128xf32, #tpu.memory_space<vmem>>, vector<16x128xf32>
    %c0_2 = arith.constant 0 : index
    %c0_3 = arith.constant 0 : index
    %4 = vector.load %arg3[%c0_2, %c0_3] : memref<16x128xf32, #tpu.memory_space<vmem>>, vector<16x128xf32>
    %5 = arith.subf %3, %4 : vector<16x128xf32>
    %cst = arith.constant 5.000000e+00 : f32
    %6 = vector.broadcast %cst : f32 to vector<16x128xf32>
    %7 = arith.mulf %5, %6 : vector<16x128xf32>
    %cst_4 = arith.constant 0.000000e+00 : f32
    %8 = vector.broadcast %cst_4 : f32 to vector<16x128xf32>
    %9 = arith.subf %8, %7 : vector<16x128xf32>
    %cst_5 = arith.constant 0.000000e+00 : f32
    %10 = vector.broadcast %cst_5 : f32 to vector<16x128xf32>
    %11 = arith.maximumf %9, %10 : vector<16x128xf32>
    %12 = math.absf %7 : vector<16x128xf32>
    %cst_6 = arith.constant 0.000000e+00 : f32
    %13 = vector.broadcast %cst_6 : f32 to vector<16x128xf32>
    %14 = arith.subf %13, %12 : vector<16x128xf32>
    %15 = math.exp %14 : vector<16x128xf32>
    %16 = math.log1p %15 : vector<16x128xf32>
    %17 = arith.addf %11, %16 : vector<16x128xf32>
    %c1_i32 = arith.constant 1 : i32
    %18 = arith.muli %arg0, %c1_i32 : i32
    %19 = arith.addi %18, %arg1 : i32
    %c1_i32_7 = arith.constant 1 : i32
    %20 = arith.cmpi slt, %19, %c1_i32_7 : i32
    %21 = arith.extui %20 : i1 to i32
    %c0_i32_8 = arith.constant 0 : i32
    %22 = arith.cmpi ne, %21, %c0_i32_8 : i32
    scf.if %22 {
      %c0_13 = arith.constant 0 : index
      %c0_14 = arith.constant 0 : index
      %29 = vector.load %arg5[%c0_13, %c0_14] : memref<8x128xf32, #tpu.memory_space<vmem>>, vector<8x128xf32>
      %30 = vector.shape_cast %17 : vector<16x128xf32> to vector<2x8x128xf32>
      %cst_15 = arith.constant dense<0.000000e+00> : vector<8x128xf32>
      %31 = vector.multi_reduction <add>, %30, %cst_15 [0] : vector<2x8x128xf32> to vector<8x128xf32>
      %32 = arith.addf %29, %31 : vector<8x128xf32>
      %c0_16 = arith.constant 0 : index
      %c0_17 = arith.constant 0 : index
      %33 = vector.load %arg5[%c0_16, %c0_17] : memref<8x128xf32, #tpu.memory_space<vmem>>, vector<8x128xf32>
      tpu.vector_store %arg5[%c0_16, %c0_17], %32 {strides = array<i32>} : memref<8x128xf32, #tpu.memory_space<vmem>>, vector<8x128xf32>,
    } else {
    }
    %c1_i32_9 = arith.constant 1 : i32
    %23 = arith.cmpi sge, %19, %c1_i32_9 : i32
    %24 = arith.extui %23 : i1 to i32
    %c0_i32_10 = arith.constant 0 : i32
    %25 = arith.cmpi ne, %24, %c0_i32_10 : i32
    scf.if %25 {
      %c2048_i32 = arith.constant 2048 : i32
      %29 = arith.muli %19, %c2048_i32 : i32
      %30 = tpu.iota {dimensions = array<i32: 0>} : vector<16x128xi32>
      %31 = tpu.iota {dimensions = array<i32: 1>} : vector<16x128xi32>
      %c128_i32 = arith.constant 128 : i32
      %32 = vector.broadcast %c128_i32 : i32 to vector<16x128xi32>
      %33 = arith.muli %30, %32 : vector<16x128xi32>
      %34 = vector.broadcast %29 : i32 to vector<16x128xi32>
      %35 = arith.addi %34, %33 : vector<16x128xi32>
      %36 = arith.addi %35, %31 : vector<16x128xi32>
      %c2048_i32_13 = arith.constant 2048 : i32
      %37 = vector.broadcast %c2048_i32_13 : i32 to vector<16x128xi32>
      %38 = arith.cmpi slt, %36, %37 : vector<16x128xi32>
      %cst_14 = arith.constant 0.000000e+00 : f32
      %39 = vector.broadcast %cst_14 : f32 to vector<16x128xf32>
      %40 = arith.select %38, %17, %39 : vector<16x128xi1>, vector<16x128xf32>
      %c0_15 = arith.constant 0 : index
      %c0_16 = arith.constant 0 : index
      %41 = vector.load %arg5[%c0_15, %c0_16] : memref<8x128xf32, #tpu.memory_space<vmem>>, vector<8x128xf32>
      %42 = vector.shape_cast %40 : vector<16x128xf32> to vector<2x8x128xf32>
      %cst_17 = arith.constant dense<0.000000e+00> : vector<8x128xf32>
      %43 = vector.multi_reduction <add>, %42, %cst_17 [0] : vector<2x8x128xf32> to vector<8x128xf32>
      %44 = arith.addf %41, %43 : vector<8x128xf32>
      %c0_18 = arith.constant 0 : index
      %c0_19 = arith.constant 0 : index
      %45 = vector.load %arg5[%c0_18, %c0_19] : memref<8x128xf32, #tpu.memory_space<vmem>>, vector<8x128xf32>
      tpu.vector_store %arg5[%c0_18, %c0_19], %44 {strides = array<i32>} : memref<8x128xf32, #tpu.memory_space<vmem>>, vector<8x128xf32>,
    } else {
    }
    %c0_i32_11 = arith.constant 0 : i32
    %26 = arith.cmpi eq, %arg1, %c0_i32_11 : i32
    %27 = arith.extui %26 : i1 to i32
    %c0_i32_12 = arith.constant 0 : i32
    %28 = arith.cmpi ne, %27, %c0_i32_12 : i32
    scf.if %28 {
      %c0_13 = arith.constant 0 : index
      %c0_14 = arith.constant 0 : index
      %29 = vector.load %arg5[%c0_13, %c0_14] : memref<8x128xf32, #tpu.memory_space<vmem>>, vector<8x128xf32>
      %c0_15 = arith.constant 0 : index
      %c0_16 = arith.constant 0 : index
      %30 = vector.load %arg4[%c0_15, %c0_16] : memref<8x128xf32, #tpu.memory_space<vmem>>, vector<8x128xf32>
      tpu.vector_store %arg4[%c0_15, %c0_16], %29 {strides = array<i32>} : memref<8x128xf32, #tpu.memory_space<vmem>>, vector<8x128xf32>,
    } else {
    }
    return
  }
  func.func @transform_0(%arg0: i32, %arg1: i32) -> (i32, i32) {
    %c1_i32 = arith.constant 1 : i32
    %0 = arith.muli %arg0, %c1_i32 : i32
    %1 = arith.addi %0, %arg1 : i32
    %c0_i32 = arith.constant 0 : i32
    %2 = arith.minsi %1, %c0_i32 : i32
    %c0_i32_0 = arith.constant 0 : i32
    %c0_i32_1 = arith.constant 0 : i32
    return %2, %c0_i32_0 : i32, i32
  }
  func.func @transform_1(%arg0: i32, %arg1: i32) -> (i32, i32) {
    %c1_i32 = arith.constant 1 : i32
    %0 = arith.muli %arg0, %c1_i32 : i32
    %1 = arith.addi %0, %arg1 : i32
    %c0_i32 = arith.constant 0 : i32
    %2 = arith.minsi %1, %c0_i32 : i32
    %c0_i32_0 = arith.constant 0 : i32
    %c0_i32_1 = arith.constant 0 : i32
    return %2, %c0_i32_0 : i32, i32
  }
  func.func @transform_2(%arg0: i32, %arg1: i32) -> (i32, i32) {
    %c0_i32 = arith.constant 0 : i32
    %c0_i32_0 = arith.constant 0 : i32
    return %arg0, %c0_i32 : i32, i32
  }
}

</mosaic_0001>

<bundles_post_ra>
// kernel: tpu_custom_call.1
= control target key start
LH: loop header
LB: loop body
LE: loop exit
PB: predicated region body
PF: predicated region fallthrough
CT: control target
= control target key end

     0   :  { %7 = vsyncpa [#allocation4], 0  ;;  %s965_s0 = inlined_call_operand.hbm [shape: f32[16,128], index: 0, kind: input, shape index: {}]   ;;  %s966_s1 = inlined_call_operand.hbm [shape: f32[16,128], index: 1, kind: input, shape index: {}]   ;;  %s967_s2 = inlined_call_operand.hbm [shape: f32[16,128], index: 2, kind: output, shape index: {}]  }
   0x1   :  { %9 = vsyncpa [#allocation4 + $0x1], 0 }
   0x2   :  { %10 = vsyncpa [#allocation7], 0 }
   0x3   :  { %12 = vsyncpa [#allocation7 + $0x1], 0 }
   0x4   :  { %13 = vsyncpa [#allocation5], 0 }
   0x5   :  { %15 = vsyncpa [#allocation5 + $0x1], 0  ;;  %s754_s9 = smov 0   ;;  %s756_s10 = smov 0  }
   0x6   :  { %s758_s11 = smov 0   ;;  %s760_s12 = smov 0  }
   0x7   :  { %s762_s13 = smov 0   ;;  %s764_s14 = smov 0  }
   0x8   :  { %s766_s15 = smov 0   ;;  %s768_s16 = smov 0  }
   0x9 LB: > { %s439_s17 = sadd.s32 4294967295, %s731_s16   ;;  %s440_s18 = sadd.s32 4294967294, %s731_s16   ;;  %s731_s16 = sphi %s768_s16, %s21_s16   ;;  %s727_s15 = sphi %s766_s15, %s986_s15   ;;  %s723_s14 = sphi %s764_s14, %s985_s14   ;;  %s719_s13 = sphi %s762_s13, %s955_s13   ;;  %s715_s12 = sphi %s760_s12, %s984_s12   ;;  %s711_s11 = sphi %s758_s11, %s983_s11   ;;  %s707_s10 = sphi %s756_s10, %s982_s10   ;;  %s703_s9 = sphi %s754_s9, %s981_s9  }
   0xa   : > { %s33_s19 = sadd.s32 1, %s727_s15  ;;  %p700_p1 = scmp.ne.s32.totalorder %s719_s13, 0 }
   0xb   : > { %p35_p0 = scmp.ge.s32.totalorder %s33_s19, 2  ;;  %p54_p2 = scmp.eq.s32.totalorder %s731_s16, 0 }
   0xc   : > { %p59_p3 = scmp.ne.s32.totalorder %s719_s13, %s715_s12  ;;  %p60_p5 = scmp.eq.s32.totalorder %s439_s17, 0 }
   0xd   : > { %s988_s19 = smov (%p35_p0, %s33_s19), 0  ;;  %p800_p4 = por %p700_p1, %p54_p2 }
   0xe   : > { %p804_p6 = por %p60_p5, %p59_p3  ;;  %s101_s22 = ssub.s32 %s727_s15, %s988_s19 }
   0xf   : > { %p102_p7 = scmp.eq.s32.totalorder %s101_s22, 0  ;;  %s104_s23 = sadd.s32 1, %s711_s11 }
  0x10   : > { %s971_s21 = scalar_select %p804_p6, 1, 0 }
  0x11   : > { %s812_s24 = scalar_select %p102_p7, %s711_s11, %s104_s23  }
  0x12   : > { %p114_p8 = scmp.ne.s32.totalorder %s711_s11, %s707_s10  ;;  %p115_p9 = scmp.eq.s32.totalorder %s439_s17, 1 }
  0x13   : > { %p120_p10 = scmp.ne.s32.totalorder %s707_s10, %s703_s9  ;;  %p121_p11 = scmp.eq.s32.totalorder %s440_s18, 1 }
  0x14   : > { %p818_p12 = por %p115_p9, %p114_p8  ;;  %p479_p1 = scmp.lt.s32.totalorder %s731_s16, 2 }
  0x15   : > { %p823_p0 = por %p121_p11, %p120_p10  ;;  %s733_s27 = smov [#allocation3]  }
  0x16   : > { %s972_s25 = scalar_select %p818_p12, 1, 0 }
  0x17   : > { %s973_s26 = scalar_select %p823_p0, 1, 0 }
  0x18   : > { %s155_s28 = sshll.u32 %s733_s27, 4  ;;  %p830_p2 = pnand %p479_p1, %p800_p4  ;;  %s156_s28 = int_to_ptr.vmem [resolvable:$true] %s155_s28 }
  0x19   : > { %s564_s4 = scalar_lea.hbm %s965_s0, 256 }
  0x1a   : > { %p565_p3 = scmp.ne.s32.totalorder %s965_s0, %s564_s4  ;;  %p566_p5 = pneg %p830_p2 }
  0x1b   : > { %p571_p8 = scmp.lt.u32.totalorder %s564_s4, %s564_s4  ;;  %p573_p9 = scmp.lt.u32.totalorder %s564_s4, %s965_s0 }
  0x1c   : > { %p567_p7 = pnand %p566_p5, %p565_p3 }
  0x1d   : > { %p574_p10 = por %p573_p9, %p571_p8 }
  0x1e   : > { %p568_p4 = pneg %p567_p7 }
  0x20   : > { %p575_p11 = pnand %p574_p10, %p568_p4 }
  0x22   : > { %578 = shalt.err (!%p575_p11)
}
  0x23   : > { %s579_s12 = scalar_lea.vmem %s156_s28, 256  ;;  %s586_s17 = scalar_lea.vmem %s156_s28, 512 }
  0x24   : > { %p580_p1 = scmp.ne.s32.totalorder %s156_s28, %s579_s12  ;;  %p587_p12 = scmp.lt.s32.totalorder %s156_s28, %s156_s28 }
  0x25   : > { %p588_p6 = scmp.lt.s32.totalorder %s586_s17, %s579_s12 }
  0x26   : > { %p582_p13 = pnand %p580_p1, %p566_p5 }
  0x27   : > { %p589_p3 = por %p588_p6, %p587_p12 }
  0x28   : > { %p583_p0 = pneg %p582_p13 }
  0x2a   : > { %p590_p7 = pnand %p589_p3, %p583_p0 }
  0x2c   : > { %593 = shalt.err (!%p590_p7)
}
  0x2d   : > { %s734_s18 = smov 128   ;;  %s735_s20 = smov 8  }
  0x2e   : > { %471 = dma.hbm_to_vmem [thread:$0]  (!%p830_p2), %s965_s0, 256, %s156_s28, [#allocation4], %s734_s18, %s734_s18, %s735_s20  }
  0x2f   : > { %p449_p13 = scmp.ge.s32.totalorder %s731_s16, 1  ;;  %p187_p4 = scmp.lt.s32.totalorder %s731_s16, 3 }
  0x30   : > { %s736_s30 = smov [#allocation6]   ;;  %s594_s6 = scalar_lea.hbm %s966_s1, 256 }
  0x31   : > { %p861_p8 = pnand %p449_p13, %p187_p4  ;;  %s179_s3 = sshll.u32 %s736_s30, 4  ;;  %s180_s3 = int_to_ptr.vmem [resolvable:$true] %s179_s3 }
  0x32   : > { %p595_p6 = scmp.ne.s32.totalorder %s966_s1, %s594_s6  ;;  %p601_p9 = scmp.lt.u32.totalorder %s594_s6, %s594_s6 }
  0x33   : > { %s975_s27 = scalar_select %p861_p8, 1, 0 }
  0x34   : > { %p597_p12 = pnand %p595_p6, %p566_p5  ;;  %p603_p10 = scmp.lt.u32.totalorder %s594_s6, %s966_s1 }
  0x36   : > { %p598_p0 = pneg %p597_p12  ;;  %p604_p11 = por %p603_p10, %p601_p9 }
  0x38   : > { %p605_p1 = pnand %p604_p11, %p598_p0 }
  0x3a   : > { %608 = shalt.err (!%p605_p1)
}
  0x3b   : > { %s609_s17 = scalar_lea.vmem %s180_s3, 256  ;;  %s616_s22 = scalar_lea.vmem %s180_s3, 512 }
  0x3c   : > { %p610_p3 = scmp.ne.s32.totalorder %s180_s3, %s609_s17  ;;  %p617_p4 = scmp.lt.s32.totalorder %s180_s3, %s180_s3 }
  0x3d   : > { %p618_p8 = scmp.lt.s32.totalorder %s616_s22, %s609_s17 }
  0x3e   : > { %p612_p7 = pnand %p610_p3, %p566_p5 }
  0x3f   : > { %p619_p6 = por %p618_p8, %p617_p4 }
  0x40   : > { %p613_p13 = pneg %p612_p7 }
  0x42   : > { %p620_p12 = pnand %p619_p6, %p613_p13 }
  0x44   : > { %623 = shalt.err (!%p620_p12)
}
  0x45   : > { %474 = dma.hbm_to_vmem [thread:$0]  (!%p830_p2), %s966_s1, 256, %s180_s3, [#allocation7], %s734_s18, %s734_s18, %s735_s20  }
  0x46   : > { %p976_p0 = scmp.ne.s32.totalorder %s975_s27, 0 }
  0x47   : > { %s193_s4 = sand.u32 (!%p976_p0), 1, %s719_s13   ;;  %p977_p5 = scmp.ne.s32.totalorder (!%p976_p0), %s971_s21, 0 }
  0x48   : > { %191 = sbr.rel (%p976_p0) target bundleno = 174 (0xae), region = 28  ;;  %s450_s5 = sshll.u32 (!%p976_p0), %s193_s4, 4 }
  0x49   : > { %s194_s6 = scalar_lea.sflag (!%p976_p0), [#allocation4], %s193_s4  ;;  %s197_s7 = scalar_lea.vmem (!%p976_p0), [#allocation3], %s450_s5 }
  0x4f   : > { %689 = dma.done.wait (%p977_p5), %s194_s6, 256  }
  0x50   : > { %691 = vsyncadd (%p977_p5), %s194_s6, 4294967040  ;;  %s203_s29 = scalar_lea.sflag [#allocation7], %s193_s4  ;;  %s206_s8 = scalar_lea.vmem [#allocation6], %s450_s5 }
  0x51   : > { %693 = dma.done.wait (%p977_p5), %s203_s29, 256  }
  0x52   : > { %695 = vsyncadd (%p977_p5), %s203_s29, 4294967040  ;;  %s229_s18 = sand.u32 1, %s707_s10   ;;  %v737_v0 = vmov 0.0   ;;  %v245_v1 = vld [vmem:[%s197_s7] sm:$0xff]  ;;  %v246_v2 = vld [vmem:[%s197_s7 + $0x8] sm:$0xff]  ;;  %p453_p2 = scmp.ge.s32.totalorder %s723_s14, 1 }
  0x53   : > { %s902_s20 = sshll.u32 %s229_s18, 3  ;;  %244 = vst [vmem:[#allocation2] sm:$0xff] %v737_v0  ;;  %v247_v3 = vld [vmem:[%s206_s8] sm:$0xff]  ;;  %v248_v4 = vld [vmem:[%s206_s8 + $0x8] sm:$0xff] }
  0x54   : > { %v249_v5 = vsub.f32 %v245_v1, %v247_v3  ;;  %v250_v6 = vsub.f32 %v246_v2, %v248_v4  ;;  %s231_s21 = scalar_lea.vmem [#allocation8], %s902_s20 }
  0x56   : > { %v251_v7 = vmul.f32 5.0, %v249_v5  ;;  %v252_v8 = vmul.f32 5.0, %v250_v6 }
  0x58   : > { %v257_v9 = vand.u32 2147483647, %v251_v7  ;;  %v258_v10 = vand.u32 2147483647, %v252_v8  ;;  %v253_v22 = vsub.f32 0.0, %v251_v7  ;;  %v254_v25 = vsub.f32 0.0, %v252_v8 }
  0x5a   : > { %v259_v11 = vsub.f32 0.0, %v257_v9  ;;  %v260_v12 = vsub.f32 0.0, %v258_v10  ;;  %v255_v29 = vmax.f32 %v253_v22, 0.0  ;;  %v256_v32 = vmax.f32 %v254_v25, 0.0  ;;  %v290_v39 = vld [vmem:[#allocation2] sm:$0xff] (!%p453_p2) }
  0x5c   : > { %v261_v13 = vmul.f32 1.442695, %v259_v11  ;;  %v263_v14 = vmul.f32 1.442695, %v260_v12 }
  0x5e   : > { %556 = vpow2.f32 %v261_v13 }
  0x5f   : > { %558 = vpow2.f32 %v263_v14 }
  0x68   : > { %v557_v15 = vpop.eup %556 }
  0x69   : > { %v559_v16 = vpop.eup %558  ;;  %v265_v17 = vadd.f32 1.0, %v557_v15  ;;  %v268_v19 = vmul.f32 -0.5, %v557_v15  ;;  %v271_v23 = vand.u32 2147483647, %v557_v15 }
  0x6a   : > { %v274_v18 = vadd.f32 1.0, %v559_v16  ;;  %v277_v20 = vmul.f32 -0.5, %v559_v16  ;;  %v280_v26 = vand.u32 2147483647, %v559_v16 }
  0x6b   : > { %560 = vlog2.f32 %v265_v17  ;;  %v269_v21 = vadd.f32 1.0, %v268_v19  ;;  %vm272_vm0 = vcmp.lt.f32.partialorder %v271_v23, 0.0004427343 }
  0x6c   : > { %562 = vlog2.f32 %v274_v18  ;;  %v278_v24 = vadd.f32 1.0, %v277_v20  ;;  %vm281_vm1 = vcmp.lt.f32.partialorder %v280_v26, 0.0004427343 }
  0x6d   : > { %v270_v27 = vmul.f32 %v557_v15, %v269_v21 }
  0x6e   : > { %v279_v30 = vmul.f32 %v559_v16, %v278_v24 }
  0x74   : > { %289 = sbr.rel (%p453_p2) target bundleno = 129 (0x81), region = 44 }
  0x75   : > { %v561_v28 = vpop.eup %560 }
  0x76   : > { %v563_v31 = vpop.eup %562  ;;  %v267_v33 = vmul.f32 0.6931472, %v561_v28 }
  0x77   : > { %v276_v34 = vmul.f32 0.6931472, %v563_v31 }
  0x78   : > { %v273_v35 = vsel %vm272_vm0, %v270_v27, %v267_v33 }
  0x79   : > { %v282_v36 = vsel %vm281_vm1, %v279_v30, %v276_v34  ;;  %v283_v37 = vadd.f32 %v273_v35, %v255_v29 }
  0x7a   : > { %v284_v38 = vadd.f32 %v282_v36, %v256_v32 }
  0x7c   : > { %v291_v40 = vadd.f32 %v284_v38, %v283_v37 }
  0x7e   : > { %v292_v41 = vadd.f32 %v291_v40, %v290_v39 }
  0x80   : > { %293 = vst [vmem:[#allocation2] sm:$0xff] %v292_v41 }
  0x81 PF: > { %p454_p8 = scmp.lt.s32.totalorder %s723_s14, 1 }
  0x82   : > { %s455_s27 = sshll.u32 (!%p454_p8), %s723_s14, 11  ;;  %v299_v42 = vlaneseq (!%p454_p8) }
  0x83   : > { %297 = sbr.rel (%p454_p8) target bundleno = 149 (0x95), region = 48  ;;  %v306_v44 = vstv (!%p454_p8), %s455_s27 }
  0x84   : > { %v300_v43 = vshrl.u32 (!%p454_p8), %v299_v42, 7  ;;  %v303_v46 = vand.u32 (!%p454_p8), 127, %v299_v42 }
  0x86   : > { %v301_v45 = vadd.s32 (!%p454_p8), 8, %v300_v43  ;;  %v304_v47 = vmul.u32 (!%p454_p8), 128, %v300_v43 }
  0x87   : > { %v315_v55 = vld [vmem:[#allocation2] sm:$0xff] (!%p454_p8) }
  0x88   : > { %v305_v48 = vmul.u32 (!%p454_p8), 128, %v301_v45  ;;  %v307_v49 = vadd.s32 (!%p454_p8), %v306_v44, %v304_v47 }
  0x8a   : > { %v308_v50 = vadd.s32 %v306_v44, %v305_v48  ;;  %v309_v51 = vadd.s32 %v307_v49, %v303_v46 }
  0x8c   : > { %v310_v52 = vadd.s32 %v308_v50, %v303_v46  ;;  %vm311_vm2 = vcmp.lt.s32.totalorder %v309_v51, 2048 }
  0x8d   : > { %v313_v53 = vsel %vm311_vm2, %v283_v37, 0.0 }
  0x8e   : > { %vm312_vm3 = vcmp.lt.s32.totalorder %v310_v52, 2048 }
  0x8f   : > { %v314_v54 = vsel %vm312_vm3, %v284_v38, 0.0 }
  0x90   : > { %v316_v56 = vadd.f32 %v314_v54, %v313_v53 }
  0x92   : > { %v317_v57 = vadd.f32 %v316_v56, %v315_v55 }
  0x94   : > { %318 = vst [vmem:[#allocation2] sm:$0xff] %v317_v57 }
  0x95 PF: > { %s457_s3 = sshll.u32 %s723_s14, 7  ;;  %s338_s22 = sshll.u32 %s231_s21, 4  ;;  %s339_s22 = int_to_ptr.vmem [resolvable:$true] %s338_s22 }
  0x96   : > { %s914_s17 = scalar_lea.hbm %s967_s2, %s457_s3  ;;  %s325_s23 = scalar_lea.sflag [#allocation5], %s229_s18 }
  0x97   : > { %s624_s30 = scalar_lea.vmem %s339_s22, 128  ;;  %p978_p10 = scmp.ne.s32.totalorder %s972_s25, 0 }
  0x98   : > { %p625_p9 = scmp.ne.s32.totalorder %s339_s22, %s624_s30  ;;  %s738_s4 = smov [#allocation8]  }
  0x99   : > { %s628_s5 = sshll.u32 %s738_s4, 4  ;;  %s629_s5 = int_to_ptr.vmem [resolvable:$false] %s628_s5 }
  0x9a   : > { %p626_p11 = pnand %p625_p9, %p978_p10  ;;  %s630_s14 = scalar_lea.vmem %s629_s5, 256 }
  0x9b   : > { %v322_v58 = vld [vmem:[#allocation2] sm:$0xff]  ;;  %p631_p3 = scmp.lt.s32.totalorder %s339_s22, %s629_s5  ;;  %p632_p7 = scmp.lt.s32.totalorder %s630_s14, %s624_s30 }
  0x9c   : > { %323 = vst [vmem:[%s231_s21] sm:$0xff] %v322_v58  ;;  %p627_p1 = pneg %p626_p11 }
  0x9d   : > { %p633_p13 = por %p632_p7, %p631_p3 }
  0x9f   : > { %p634_p4 = pnand %p633_p13, %p627_p1 }
  0xa1   : > { %637 = shalt.err (!%p634_p4)
}
  0xa2   : > { %s638_s6 = scalar_lea.hbm %s914_s17, 128  ;;  %s642_s8 = scalar_lea.hbm %s967_s2, 256 }
  0xa3   : > { %p639_p6 = scmp.ne.s32.totalorder %s914_s17, %s638_s6  ;;  %p643_p5 = scmp.lt.u32.totalorder %s914_s17, %s967_s2 }
  0xa4   : > { %p644_p2 = scmp.lt.u32.totalorder %s642_s8, %s638_s6  ;;  %p646_p9 = scmp.lt.u32.totalorder %s638_s6, %s914_s17 }
  0xa5   : > { %p640_p12 = pnand %p639_p6, %p978_p10 }
  0xa6   : > { %p645_p8 = por %p644_p2, %p643_p5 }
  0xa7   : > { %p641_p0 = pneg %p640_p12 }
  0xa8   : > { %p647_p11 = por %p646_p9, %p645_p8 }
  0xaa   : > { %p648_p1 = pnand %p647_p11, %p641_p0 }
  0xac   : > { %651 = shalt.err (!%p648_p1)
}
  0xad   : > { %466 = dma.vmem_to_hbm [thread:$0]  (%p978_p10), %s339_s22, 128, %s914_s17, %s325_s23  }
  0xae PF: > { %s350_s21 = sand.u32 1, %s703_s9   ;;  %p979_p3 = scmp.ne.s32.totalorder %s973_s26, 0 }
  0xaf   : > { %p980_p7 = scmp.ge.s32.totalorder %s731_s16, 2  ;;  %s351_s27 = scalar_lea.sflag [#allocation5], %s350_s21 }
  0xb1   : > { %p476_p13 = pnand %p980_p7, %p979_p3 }
  0xb3   : > { %697 = dma.done.wait (!%p476_p13), %s351_s27, 128  }
  0xb4   : > { %699 = vsyncadd (!%p476_p13), %s351_s27, 4294967168  ;;  %s21_s16 = sadd.s32 1, %s731_s16   ;;  %s981_s9 = smov %s707_s10 }
  0xb5   : > { %p18_p4 = scmp.ge.s32.totalorder %s21_s16, 4   ;;  %s982_s10 = smov %s711_s11 }
  0xb6   : > { %s983_s11 = smov %s812_s24  ;;  %s984_s12 = smov %s719_s13 }
  0xb7   : > { %s955_s13 = smov 0   ;;  %s985_s14 = smov %s727_s15 }
  0xb8   : > { %s986_s15 = smov %s988_s19  ;;  %20 = sbr.rel (!%p18_p4) target bundleno = 9 (0x9), region = 102 }
  0xbf   :  { %356 = vsyncpa [#allocation4], 1 }
  0xc0   :  { %358 = vsyncpa [#allocation4 + $0x1], 1 }
  0xc1   :  { %359 = vsyncpa [#allocation7], 1 }
  0xc2   :  { %361 = vsyncpa [#allocation7 + $0x1], 1 }
  0xc3   :  { %362 = vsyncpa [#allocation5], 1 }
  0xc4   :  { %364 = vsyncpa [#allocation5 + $0x1], 1 }

</bundles_post_ra>
